<compile_context>
chip_gen: v7x
topology: tpu7x:2x2x1
jax: 0.10.0
libtpu: 0.0.40
codegen_flags: <defaults>
</compile_context>

<pallas_src>
import jax
import jax.numpy as jnp
from jax.experimental import pallas as pl
from jax.experimental.pallas import tpu as pltpu

_LANE = 128            # vreg lane width
_SUB = 8               # f32 sublane count
_MAX_TILE_ROWS = 4096  # 4096 rows * 1.5 KiB/row * 2 (double-buffer) = 12 MiB, fits all gens


def _round_up(v, m):
    return ((v + m - 1) // m) * m


def linear_sigmoid_kernel(params_ref, x_ref, o_ref):
    # params_ref: SMEM (3,) = [w0, w1, bias] scalars broadcast into VPU ops.
    w0 = params_ref[0]
    w1 = params_ref[1]
    b = params_ref[2]
    x0 = x_ref[0].astype(jnp.float32)   # (tile_rows, 128) lane-dense plane, feature 0
    x1 = x_ref[1].astype(jnp.float32)   # (tile_rows, 128) lane-dense plane, feature 1
    z = x0 * w0 + x1 * w1 + b           # pure VPU FMAs; MXU deliberately unused
    # sigmoid(z) == 0.5 * (tanh(0.5*z) + 1): one EUP transcendental, no divide.
    # (EUP tanh differs from jax.nn.sigmoid at the ~1e-6/1e-7 level in f32.)
    o_ref[...] = (0.5 * (jnp.tanh(0.5 * z) + 1.0)).astype(o_ref.dtype)


def binary_classifier_forward(x, w, b, *, tile_rows=1024):
    """sigmoid(x @ w.T + b) with x:(B,2), w:(1,2), b:(1,)  ->  (B,1) float32."""
    B = x.shape[0]
    assert x.shape[1] == 2 and w.shape == (1, 2) and b.shape == (1,)

    # Keep bf16 inputs as bf16 (halves input HBM bytes); everything else runs in f32.
    x = x if x.dtype == jnp.bfloat16 else x.astype(jnp.float32)

    rows = -(-B // _LANE)               # rows of 128 batch elements (lane-dense)
    Bp = rows * _LANE

    # Tile: big blocks by default, never larger than the array, never above the
    # cross-generation VMEM cap; the ragged last block is masked by Pallas.
    if rows < _SUB:
        tr = rows                                        # block == full dim (allowed)
    else:
        tr = _round_up(max(int(tile_rows), 1), _SUB)
        tr = min(tr, (rows // _SUB) * _SUB, _MAX_TILE_ROWS)
    nblocks = -(-rows // tr)

    # One fused XLA pass builds the two lane-dense feature planes (see TODO above).
    xt = x.T                                             # (2, B)
    if B != Bp:
        xt = jnp.pad(xt, ((0, 0), (0, Bp - B)))          # zero tail -> harmless sigmoid(b)
    xp = xt.reshape(2, rows, _LANE)                      # (2, rows, 128)

    params = jnp.concatenate(
        [w.reshape(-1), b.reshape(-1)]).astype(jnp.float32)   # (3,) = [w0, w1, bias]

    in_bytes = 2 * B * xp.dtype.itemsize
    cost = pl.CostEstimate(flops=4 * B, transcendentals=B,
                           bytes_accessed=int(in_bytes + Bp * 4 + 12))

    out = pl.pallas_call(
        linear_sigmoid_kernel,
        out_shape=jax.ShapeDtypeStruct((rows, _LANE), jnp.float32),
        grid=(nblocks,),
        in_specs=[
            pl.BlockSpec(memory_space=pltpu.SMEM),                # params scalars
            pl.BlockSpec((2, tr, _LANE), lambda i: (0, i, 0)),    # lane-dense x planes
        ],
        out_specs=pl.BlockSpec((tr, _LANE), lambda i: (i, 0)),    # lane-dense output
        compiler_params=pltpu.CompilerParams(
            # Independent row blocks: lets megacore / v7x's two TCs split the batch axis.
            dimension_semantics=("parallel",),
            # 32 MiB scoped VMEM is safe on v5e/v6e/v7x and covers the 4096-row tile cap.
            vmem_limit_bytes=32 * 1024 * 1024,
        ),
        cost_estimate=cost,
    )(params, xp)

    out_flat = out.reshape(Bp, 1)                        # free (contiguous) reshape
    # Slice only when the batch is not lane-aligned; aligned batches avoid the copy.
    return out_flat if B == Bp else out_flat[:B]


if __name__ == "__main__":
    key = jax.random.PRNGKey(0)
    kx, kw, kb, kx2 = jax.random.split(key, 4)

    IN_F, OUT_F = 2, 1
    bound = 1.0 / jnp.sqrt(IN_F)
    # Deterministic "parameter init" mimicking nn.Linear(2, 1) shapes.
    w = jax.random.uniform(kw, (OUT_F, IN_F), jnp.float32, -bound, bound)
    b = jax.random.uniform(kb, (OUT_F,), jnp.float32, -bound, bound)

    # Small shape consistent with the module: batch=8, in_features=2.
    B = 8
    x = jax.random.normal(kx, (B, IN_F), jnp.float32)
    out = binary_classifier_forward(x, w, b)
    jax.block_until_ready(out)
    ref = jax.nn.sigmoid(x @ w.T + b)
    assert out.shape == (B, OUT_F)
    assert jnp.allclose(out, ref, atol=1e-5), "mismatch vs reference (B=8)"

    # Exercise the padded batch, multi-block grid and ragged (masked) last block:
    # B2=3000 -> rows=24; tile_rows=16 -> blocks of 16 rows, last block ragged.
    B2 = 3000
    x2 = jax.random.normal(kx2, (B2, IN_F), jnp.float32)
    out2 = binary_classifier_forward(x2, w, b, tile_rows=16)
    jax.block_until_ready(out2)
    ref2 = jax.nn.sigmoid(x2 @ w.T + b)
    assert out2.shape == (B2, OUT_F)
    assert jnp.allclose(out2, ref2, atol=1e-5), "mismatch vs reference (B=3000)"

    print("KERNEL_OK")
</pallas_src>

<mosaic_0001>
module attributes {stable_mosaic.version = 11 : i64} {
  func.func @linear_sigmoid_kernel(%arg0: i32, %arg1: memref<3xf32, #tpu.memory_space<smem>>, %arg2: memref<2x1x128xf32, #tpu.memory_space<vmem>>, %arg3: memref<1x128xf32, #tpu.memory_space<vmem>>) attributes {dimension_semantics = [#tpu.dimension_semantics<parallel>], iteration_bounds = array<i64: 1>, scalar_prefetch = 0 : i64, scratch_operands = 0 : i64, tpu.core_type = #tpu.core_type<tc>, window_params = [{transform_indices = @transform_0, window_bounds = array<i64: 3>}, {transform_indices = @transform_1, window_bounds = array<i64: 2, 1, 128>}, {transform_indices = @transform_2, window_bounds = array<i64: 1, 128>}]} {
    %c0 = arith.constant 0 : index
    %0 = memref.load %arg1[%c0] : memref<3xf32, #tpu.memory_space<smem>>
    %c1 = arith.constant 1 : index
    %1 = memref.load %arg1[%c1] : memref<3xf32, #tpu.memory_space<smem>>
    %c2 = arith.constant 2 : index
    %2 = memref.load %arg1[%c2] : memref<3xf32, #tpu.memory_space<smem>>
    %c0_0 = arith.constant 0 : index
    %c0_1 = arith.constant 0 : index
    %c0_2 = arith.constant 0 : index
    %3 = vector.load %arg2[%c0_0, %c0_1, %c0_2] : memref<2x1x128xf32, #tpu.memory_space<vmem>>, vector<1x1x128xf32>
    %4 = vector.shape_cast %3 : vector<1x1x128xf32> to vector<1x128xf32>
    %c1_3 = arith.constant 1 : index
    %c0_4 = arith.constant 0 : index
    %c0_5 = arith.constant 0 : index
    %5 = vector.load %arg2[%c1_3, %c0_4, %c0_5] : memref<2x1x128xf32, #tpu.memory_space<vmem>>, vector<1x1x128xf32>
    %6 = vector.shape_cast %5 : vector<1x1x128xf32> to vector<1x128xf32>
    %7 = vector.broadcast %0 : f32 to vector<1x128xf32>
    %8 = arith.mulf %4, %7 : vector<1x128xf32>
    %9 = vector.broadcast %1 : f32 to vector<1x128xf32>
    %10 = arith.mulf %6, %9 : vector<1x128xf32>
    %11 = arith.addf %8, %10 : vector<1x128xf32>
    %12 = vector.broadcast %2 : f32 to vector<1x128xf32>
    %13 = arith.addf %11, %12 : vector<1x128xf32>
    %cst = arith.constant 5.000000e-01 : f32
    %14 = vector.broadcast %cst : f32 to vector<1x128xf32>
    %15 = arith.mulf %14, %13 : vector<1x128xf32>
    %16 = math.tanh %15 : vector<1x128xf32>
    %cst_6 = arith.constant 1.000000e+00 : f32
    %17 = vector.broadcast %cst_6 : f32 to vector<1x128xf32>
    %18 = arith.addf %16, %17 : vector<1x128xf32>
    %cst_7 = arith.constant 5.000000e-01 : f32
    %19 = vector.broadcast %cst_7 : f32 to vector<1x128xf32>
    %20 = arith.mulf %19, %18 : vector<1x128xf32>
    %c0_8 = arith.constant 0 : index
    %c0_9 = arith.constant 0 : index
    %21 = vector.load %arg3[%c0_8, %c0_9] : memref<1x128xf32, #tpu.memory_space<vmem>>, vector<1x128xf32>
    tpu.vector_store %arg3[%c0_8, %c0_9], %20 {strides = array<i32>} : memref<1x128xf32, #tpu.memory_space<vmem>>, vector<1x128xf32>,
    return
  }
  func.func @transform_0(%arg0: i32) -> i32 {
    %c0_i32 = arith.constant 0 : i32
    %c0_i32_0 = arith.constant 0 : i32
    return %c0_i32 : i32
  }
  func.func @transform_1(%arg0: i32) -> (i32, i32, i32) {
    %c0_i32 = arith.constant 0 : i32
    %c0_i32_0 = arith.constant 0 : i32
    %c0_i32_1 = arith.constant 0 : i32
    return %c0_i32, %arg0, %c0_i32_0 : i32, i32, i32
  }
  func.func @transform_2(%arg0: i32) -> (i32, i32) {
    %c0_i32 = arith.constant 0 : i32
    %c0_i32_0 = arith.constant 0 : i32
    return %arg0, %c0_i32 : i32, i32
  }
}

</mosaic_0001>

<bundles_post_ra>
// kernel: tpu_custom_call.1
= control target key start
LH: loop header
LB: loop body
LE: loop exit
PB: predicated region body
PF: predicated region fallthrough
CT: control target
= control target key end

     0   :  { %7 = vsyncpa [#allocation4], 0  ;;  %s146_s0 = inlined_call_operand.hbm [shape: f32[3], index: 0, kind: input, shape index: {}]   ;;  %s147_s1 = inlined_call_operand.vmem [shape: f32[2,1,128], index: 1, kind: input, shape index: {}]   ;;  %s148_s2 = inlined_call_operand.hbm [shape: f32[1,128], index: 2, kind: output, shape index: {}]  }
   0x1   :  { %8 = vsyncpa [#allocation3], 0  ;;  %s63_s11 = scalar_lea.hbm %s146_s0, 16 }
   0x2   :  { %p64_p0 = scmp.ne.s32.totalorder %s146_s0, %s63_s11  ;;  %p67_p1 = scmp.lt.u32.totalorder %s63_s11, %s146_s0 }
   0x4   :  { %p69_p2 = pnand %p67_p1, %p64_p0 }
   0x6   :  { %72 = shalt.err (!%p69_p2)
}
   0x7   :  { %s99_s16 = smov [#allocation2]  }
   0x8   :  { %16 = dma.hbm_to_smem %s146_s0, 16, %s99_s16, [#allocation4]  }
   0x9   :  { %95 = dma.done.wait [#allocation4], 16  }
   0xa   :  { %96 = vsyncadd [#allocation4], 4294967280 }
   0xb   :  { %22 = sfence }
   0xc   :  { %s23_s19 = sld [smem:[#allocation2]]  ;;  %s56_s20 = sld [smem:[#allocation2 + $0x1]]  ;;  %v26_v0 = vld [vmem:[%s147_s1] sm:$0x1]  ;;  %v58_v1 = vld [vmem:[%s147_s1 + $0x1] sm:$0x1] }
   0xd   :  { %s57_s21 = sld [smem:[#allocation2 + $0x2]]  ;;  %s100_s0 = smov [#allocation5]  }
   0xe   :  { %s47_s26 = sshll.u32 %s100_s0, 4  ;;  %s48_s26 = int_to_ptr.vmem [resolvable:$true] %s47_s26 }
   0xf   :  { %s73_s27 = scalar_lea.vmem %s48_s26, 16  ;;  %s77_s28 = scalar_lea.vmem %s48_s26, 32 }
  0x10   :  { %p74_p3 = scmp.ne.s32.totalorder %s48_s26, %s73_s27  ;;  %p78_p4 = scmp.lt.s32.totalorder %s48_s26, %s48_s26 }
  0x11   :  { %p79_p5 = scmp.lt.s32.totalorder %s77_s28, %s73_s27 }
  0x12   :  { %v29_v2 = vstv %s23_s19  ;;  %v31_v3 = vstv %s56_s20 }
  0x13   :  { %v30_v4 = vmul.f32 %v29_v2, %v26_v0  ;;  %v32_v5 = vmul.f32 %v58_v1, %v31_v3  ;;  %v34_v6 = vstv %s57_s21  ;;  %p80_p6 = por %p79_p5, %p78_p4 }
  0x15   :  { %v33_v7 = vadd.f32 %v32_v5, %v30_v4  ;;  %p81_p7 = pnand %p80_p6, %p74_p3 }
  0x17   :  { %v35_v8 = vadd.f32 %v34_v6, %v33_v7 }
  0x19   :  { %v36_v9 = vmul.f32 0.5, %v35_v8 }
  0x1b   :  { %61 = vtanh.f32 %v36_v9 }
  0x25   :  { %v62_v10 = vpop.eup %61 }
  0x26   :  { %v38_v11 = vadd.f32 1.0, %v62_v10 }
  0x28   :  { %v39_v12 = vmul.f32 0.5, %v38_v11 }
  0x2a   :  { %40 = vst [vmem:[#allocation5] sm:$0x1] %v39_v12 }
  0x2b   :  { %84 = shalt.err (!%p81_p7)
}
  0x2c   :  { %s85_s30 = scalar_lea.hbm %s148_s2, 16 }
  0x2d   :  { %p86_p8 = scmp.ne.s32.totalorder %s148_s2, %s85_s30  ;;  %p89_p9 = scmp.lt.u32.totalorder %s85_s30, %s148_s2 }
  0x2f   :  { %p91_p10 = pnand %p89_p9, %p86_p8 }
  0x31   :  { %94 = shalt.err (!%p91_p10)
}
  0x32   :  { %50 = dma.vmem_to_hbm [thread:$0]  %s48_s26, 16, %s148_s2, [#allocation3]  }
  0x33   :  { %97 = dma.done.wait [#allocation3], 16  }
  0x34   :  { %98 = vsyncadd [#allocation3], 4294967280 }
  0x35   :  { %54 = vsyncpa [#allocation3], 1 }
  0x36   :  { %55 = vsyncpa [#allocation4], 1 }

</bundles_post_ra>
